<compile_context>
chip_gen: v6e
topology: v6e:2x2x1
jax: 0.10.0
libtpu: 0.0.40
codegen_flags: <defaults>
</compile_context>

<pallas_src>
import functools

import jax
import jax.numpy as jnp
from jax.experimental import pallas as pl
from jax.experimental.pallas import tpu as pltpu

MARGIN = 0.5
EPS = 1e-6  # matches torch.nn.functional.pairwise_distance default eps


def _round_up(x, m):
    return ((x + m - 1) // m) * m


def _vmem_capacity_bytes():
    """Best-effort physical VMEM capacity query; conservative 64 MiB fallback."""
    try:
        info = pltpu.get_tpu_info()
        for name in ("vmem_capacity_bytes", "vmem_bytes", "vmem_size_bytes"):
            v = getattr(info, name, None)
            if v:
                return int(v)
    except Exception:
        pass
    return 64 << 20


def _default_num_cores():
    """2 TensorCores per chip on v7x-like devices, 1 elsewhere."""
    try:
        kind = jax.devices()[0].device_kind.lower()
    except Exception:
        return 1
    return 2 if ("v7" in kind or "7x" in kind) else 1


def _pick_tile(b, d, num_cores, itemsize, target_block_bytes):
    """Largest multiple of 8 rows whose input block stays under budget,
    clamped to the (rounded-up) per-core batch."""
    unit = 8
    cap = max(unit, (target_block_bytes // max(1, itemsize * d)) // unit * unit)
    per_core = _round_up(max(1, pl.cdiv(b, num_cores)), unit)
    return int(min(cap, per_core))


def _kernel(x1_ref, x2_ref, lbl_ref, out_ref, acc_ref, *,
            total_b, tile_b, steps, margin, needs_mask):
    """(tile_b, D) blocks, feature dim on lanes; per-row loss accumulated in VMEM."""
    c = pl.program_id(0)
    j = pl.program_id(1)

    @pl.when(j == 0)
    def _():
        acc_ref[...] = jnp.zeros_like(acc_ref)

    x1 = x1_ref[...].astype(jnp.float32)
    x2 = x2_ref[...].astype(jnp.float32)
    lbl = lbl_ref[...].astype(jnp.float32)                   # (TB, 1)

    diff = x1 - x2 + EPS                                     # (TB, D)
    sq = jnp.sum(diff * diff, axis=-1, keepdims=True)        # (TB, 1) == d^2
    d = jnp.sqrt(sq)                                         # only for margin term
    per_row = (1.0 - lbl) * sq + lbl * jnp.square(jnp.maximum(margin - d, 0.0))

    if needs_mask:
        row0 = (c * steps + j) * tile_b
        is_tail = row0 + tile_b > total_b

        @pl.when(jnp.logical_not(is_tail))
        def _():
            acc_ref[...] += per_row                          # pure VPU add, no mask

        @pl.when(is_tail)
        def _():
            rows = row0 + jax.lax.broadcasted_iota(jnp.int32, (tile_b, 1), 0)
            # Select (not multiply): tail VMEM contents are undefined without
            # wrapper-side padding, and NaN/Inf * 0 would poison the sum.
            acc_ref[...] += jnp.where(rows < total_b, per_row, 0.0)
    else:
        acc_ref[...] += per_row

    @pl.when(j == steps - 1)
    def _():
        psum = jnp.sum(acc_ref[...], keepdims=True)          # one reduce per core
        out_ref[...] = jnp.zeros(out_ref.shape, jnp.float32) + psum


def contrastive_loss(output1, output2, label, *, margin=MARGIN, num_cores=None,
                     target_block_bytes=None):
    """output1, output2: (B, D); label: (B,). Returns scalar f32 loss."""
    B, D = output1.shape
    if num_cores is None:
        num_cores = _default_num_cores()

    itemsize = jnp.dtype(output1.dtype).itemsize
    vmem_cap = _vmem_capacity_bytes()
    if target_block_bytes is None:
        # 2 inputs x 2 pipeline buffers (+labels/acc/out) kept well under VMEM:
        # ~6 MiB/input on 64 MiB chips (v7x), up to 12 MiB on 128 MiB chips.
        target_block_bytes = max(1 << 20, min(12 << 20, (vmem_cap // 2) // 5))

    tile_b = _pick_tile(B, D, num_cores, itemsize, target_block_bytes)
    steps = int(pl.cdiv(B, num_cores * tile_b))
    nblocks = int(pl.cdiv(B, tile_b))              # valid block indices along batch
    needs_mask = (num_cores * steps * tile_b) != B

    lbl = label.reshape(B, 1).astype(jnp.float32)  # tiny; negligible wrapper cost

    def x_map(c, j):
        # Clamp so the per-core split never produces a block index fully past
        # the array; duplicated tail data is discarded by the in-kernel mask.
        return (jnp.minimum(c * steps + j, nblocks - 1), 0)

    x_spec = pl.BlockSpec((tile_b, D), x_map)
    l_spec = pl.BlockSpec((tile_b, 1), x_map)

    block_bytes = tile_b * D * itemsize
    vmem_limit = int(min(0.9 * vmem_cap,
                         max(32 << 20, 4 * block_bytes + (8 << 20))))

    kernel = functools.partial(_kernel, total_b=B, tile_b=tile_b, steps=steps,
                               margin=margin, needs_mask=needs_mask)

    out = pl.pallas_call(
        kernel,
        out_shape=jax.ShapeDtypeStruct((num_cores * 8, 128), jnp.float32),
        grid_spec=pltpu.PrefetchScalarGridSpec(
            num_scalar_prefetch=0,
            grid=(num_cores, steps),
            in_specs=[x_spec, x_spec, l_spec],
            out_specs=pl.BlockSpec((8, 128), lambda c, j: (c, 0)),
            scratch_shapes=[pltpu.VMEM((tile_b, 1), jnp.float32)],
        ),
        compiler_params=pltpu.CompilerParams(
            dimension_semantics=("parallel", "arbitrary"),
            vmem_limit_bytes=vmem_limit,
        ),
        cost_estimate=pl.CostEstimate(
            flops=int(4 * B * D + 12 * B),
            transcendentals=int(B),
            bytes_accessed=int(2 * B * D * itemsize + 4 * B
                               + num_cores * 8 * 128 * 4),
        ),
    )(output1, output2, lbl)

    partials = out[0::8, 0]                        # one partial sum per core
    return jnp.sum(partials) / jnp.float32(B)


def contrastive_loss_ref(output1, output2, label, margin=MARGIN):
    diff = output1.astype(jnp.float32) - output2.astype(jnp.float32) + EPS
    d = jnp.sqrt(jnp.sum(diff * diff, axis=-1))
    lbl = label.astype(jnp.float32)
    return jnp.mean((1.0 - lbl) * d**2 + lbl * jnp.square(jnp.maximum(margin - d, 0.0)))


if __name__ == "__main__":
    key = jax.random.PRNGKey(0)
    k1, k2, k3 = jax.random.split(key, 3)

    # Small-D case (D < 128, native row layout, batch divides tile -> no mask).
    B, D = 16, 32
    o1 = jax.random.normal(k1, (B, D), dtype=jnp.float32)
    o2 = jax.random.normal(k2, (B, D), dtype=jnp.float32)
    lb = jax.random.bernoulli(k3, 0.5, (B,)).astype(jnp.float32)
    loss = jax.block_until_ready(contrastive_loss(o1, o2, lb, num_cores=1))
    ref = contrastive_loss_ref(o1, o2, lb)
    assert jnp.allclose(loss, ref, rtol=1e-5, atol=1e-5), (loss, ref)

    # Ragged batch (partial boundary block -> jnp.where mask path, no padding).
    B2, D2 = 37, 256
    p1 = jax.random.normal(k1, (B2, D2), dtype=jnp.float32)
    p2 = jax.random.normal(k2, (B2, D2), dtype=jnp.float32)
    pl2 = jax.random.bernoulli(k3, 0.5, (B2,)).astype(jnp.float32)
    loss2 = jax.block_until_ready(contrastive_loss(p1, p2, pl2, num_cores=1))
    ref2 = contrastive_loss_ref(p1, p2, pl2)
    assert jnp.allclose(loss2, ref2, rtol=1e-5, atol=1e-5), (loss2, ref2)

    # Per-core partial-sum path with clamped block indices (v7x megacore split;
    # also correct on 1-TC chips, where the axis just runs sequentially).
    loss3 = jax.block_until_ready(contrastive_loss(p1, p2, pl2, num_cores=2))
    assert jnp.allclose(loss3, ref2, rtol=1e-5, atol=1e-5), (loss3, ref2)

    # bf16 inputs: kernel upcasts in VMEM, wrapper moves only bf16 bytes in HBM.
    b1 = p1.astype(jnp.bfloat16)
    b2 = p2.astype(jnp.bfloat16)
    loss4 = jax.block_until_ready(contrastive_loss(b1, b2, pl2))
    ref4 = contrastive_loss_ref(b1, b2, pl2)
    assert jnp.allclose(loss4, ref4, rtol=2e-2, atol=2e-2), (loss4, ref4)

    print("KERNEL_OK")
</pallas_src>

<mosaic_0001>
module attributes {stable_mosaic.version = 11 : i64} {
  func.func @_kernel(%arg0: i32, %arg1: i32, %arg2: memref<16x32xf32, #tpu.memory_space<vmem>>, %arg3: memref<16x32xf32, #tpu.memory_space<vmem>>, %arg4: memref<16x1xf32, #tpu.memory_space<vmem>>, %arg5: memref<8x128xf32, #tpu.memory_space<vmem>>, %arg6: memref<16x1xf32, #tpu.memory_space<vmem>>) attributes {dimension_semantics = [#tpu.dimension_semantics<parallel>, #tpu.dimension_semantics<arbitrary>], iteration_bounds = array<i64: 1, 1>, scalar_prefetch = 0 : i64, scratch_operands = 1 : i64, tpu.core_type = #tpu.core_type<tc>, window_params = [{transform_indices = @transform_0, window_bounds = array<i64: 16, 32>}, {transform_indices = @transform_1, window_bounds = array<i64: 16, 32>}, {transform_indices = @transform_2, window_bounds = array<i64: 16, 1>}, {transform_indices = @transform_3, window_bounds = array<i64: 8, 128>}]} {
    %c0_i32 = arith.constant 0 : i32
    %0 = arith.cmpi eq, %arg1, %c0_i32 : i32
    %1 = arith.extui %0 : i1 to i32
    %c0_i32_0 = arith.constant 0 : i32
    %2 = arith.cmpi ne, %1, %c0_i32_0 : i32
    scf.if %2 {
      %cst_16 = arith.constant 0.000000e+00 : f32
      %29 = vector.broadcast %cst_16 : f32 to vector<16x1xf32>
      %c0_17 = arith.constant 0 : index
      %c0_18 = arith.constant 0 : index
      %30 = vector.load %arg6[%c0_17, %c0_18] : memref<16x1xf32, #tpu.memory_space<vmem>>, vector<16x1xf32>
      tpu.vector_store %arg6[%c0_17, %c0_18], %29 {strides = array<i32>} : memref<16x1xf32, #tpu.memory_space<vmem>>, vector<16x1xf32>,
    } else {
    }
    %c0 = arith.constant 0 : index
    %c0_1 = arith.constant 0 : index
    %3 = vector.load %arg2[%c0, %c0_1] : memref<16x32xf32, #tpu.memory_space<vmem>>, vector<16x32xf32>
    %c0_2 = arith.constant 0 : index
    %c0_3 = arith.constant 0 : index
    %4 = vector.load %arg3[%c0_2, %c0_3] : memref<16x32xf32, #tpu.memory_space<vmem>>, vector<16x32xf32>
    %c0_4 = arith.constant 0 : index
    %c0_5 = arith.constant 0 : index
    %5 = vector.load %arg4[%c0_4, %c0_5] : memref<16x1xf32, #tpu.memory_space<vmem>>, vector<16x1xf32>
    %6 = arith.subf %3, %4 : vector<16x32xf32>
    %cst = arith.constant 9.99999997E-7 : f32
    %7 = vector.broadcast %cst : f32 to vector<16x32xf32>
    %8 = arith.addf %6, %7 : vector<16x32xf32>
    %9 = arith.mulf %8, %8 : vector<16x32xf32>
    %cst_6 = arith.constant dense<0.000000e+00> : vector<16xf32>
    %10 = vector.multi_reduction <add>, %9, %cst_6 [1] : vector<16x32xf32> to vector<16xf32>
    %11 = vector.shape_cast %10 : vector<16xf32> to vector<16x1xf32>
    %12 = math.sqrt %11 : vector<16x1xf32>
    %cst_7 = arith.constant 1.000000e+00 : f32
    %13 = vector.broadcast %cst_7 : f32 to vector<16x1xf32>
    %14 = arith.subf %13, %5 : vector<16x1xf32>
    %15 = arith.mulf %14, %11 : vector<16x1xf32>
    %cst_8 = arith.constant 5.000000e-01 : f32
    %16 = vector.broadcast %cst_8 : f32 to vector<16x1xf32>
    %17 = arith.subf %16, %12 : vector<16x1xf32>
    %cst_9 = arith.constant 0.000000e+00 : f32
    %18 = vector.broadcast %cst_9 : f32 to vector<16x1xf32>
    %19 = arith.maximumf %17, %18 : vector<16x1xf32>
    %20 = arith.mulf %19, %19 : vector<16x1xf32>
    %21 = arith.mulf %5, %20 : vector<16x1xf32>
    %22 = arith.addf %15, %21 : vector<16x1xf32>
    %c0_10 = arith.constant 0 : index
    %c0_11 = arith.constant 0 : index
    %23 = vector.load %arg6[%c0_10, %c0_11] : memref<16x1xf32, #tpu.memory_space<vmem>>, vector<16x1xf32>
    %24 = arith.addf %23, %22 : vector<16x1xf32>
    %c0_12 = arith.constant 0 : index
    %c0_13 = arith.constant 0 : index
    %25 = vector.load %arg6[%c0_12, %c0_13] : memref<16x1xf32, #tpu.memory_space<vmem>>, vector<16x1xf32>
    tpu.vector_store %arg6[%c0_12, %c0_13], %24 {strides = array<i32>} : memref<16x1xf32, #tpu.memory_space<vmem>>, vector<16x1xf32>,
    %c0_i32_14 = arith.constant 0 : i32
    %26 = arith.cmpi eq, %arg1, %c0_i32_14 : i32
    %27 = arith.extui %26 : i1 to i32
    %c0_i32_15 = arith.constant 0 : i32
    %28 = arith.cmpi ne, %27, %c0_i32_15 : i32
    scf.if %28 {
      %c0_16 = arith.constant 0 : index
      %c0_17 = arith.constant 0 : index
      %29 = vector.load %arg6[%c0_16, %c0_17] : memref<16x1xf32, #tpu.memory_space<vmem>>, vector<16x1xf32>
      %30 = vector.shape_cast %29 : vector<16x1xf32> to vector<1x16x1xf32>
      %cst_18 = arith.constant dense<0.000000e+00> : vector<1xf32>
      %31 = vector.multi_reduction <add>, %30, %cst_18 [1, 2] : vector<1x16x1xf32> to vector<1xf32>
      %32 = vector.shape_cast %31 : vector<1xf32> to vector<1x1x1xf32>
      %33 = vector.extract %32[0, 0, 0] : f32 from vector<1x1x1xf32>
      %34 = vector.broadcast %33 : f32 to vector<1x1xf32>
      %cst_19 = arith.constant 0.000000e+00 : f32
      %35 = vector.broadcast %cst_19 : f32 to vector<8x128xf32>
      %36 = vector.broadcast %34 : vector<1x1xf32> to vector<8x128xf32>
      %37 = arith.addf %35, %36 : vector<8x128xf32>
      %c0_20 = arith.constant 0 : index
      %c0_21 = arith.constant 0 : index
      %38 = vector.load %arg5[%c0_20, %c0_21] : memref<8x128xf32, #tpu.memory_space<vmem>>, vector<8x128xf32>
      tpu.vector_store %arg5[%c0_20, %c0_21], %37 {strides = array<i32>} : memref<8x128xf32, #tpu.memory_space<vmem>>, vector<8x128xf32>,
    } else {
    }
    return
  }
  func.func @transform_0(%arg0: i32, %arg1: i32) -> (i32, i32) {
    %c1_i32 = arith.constant 1 : i32
    %0 = arith.muli %arg0, %c1_i32 : i32
    %1 = arith.addi %0, %arg1 : i32
    %c0_i32 = arith.constant 0 : i32
    %2 = arith.minsi %1, %c0_i32 : i32
    %c0_i32_0 = arith.constant 0 : i32
    %c0_i32_1 = arith.constant 0 : i32
    return %2, %c0_i32_0 : i32, i32
  }
  func.func @transform_1(%arg0: i32, %arg1: i32) -> (i32, i32) {
    %c1_i32 = arith.constant 1 : i32
    %0 = arith.muli %arg0, %c1_i32 : i32
    %1 = arith.addi %0, %arg1 : i32
    %c0_i32 = arith.constant 0 : i32
    %2 = arith.minsi %1, %c0_i32 : i32
    %c0_i32_0 = arith.constant 0 : i32
    %c0_i32_1 = arith.constant 0 : i32
    return %2, %c0_i32_0 : i32, i32
  }
  func.func @transform_2(%arg0: i32, %arg1: i32) -> (i32, i32) {
    %c1_i32 = arith.constant 1 : i32
    %0 = arith.muli %arg0, %c1_i32 : i32
    %1 = arith.addi %0, %arg1 : i32
    %c0_i32 = arith.constant 0 : i32
    %2 = arith.minsi %1, %c0_i32 : i32
    %c0_i32_0 = arith.constant 0 : i32
    %c0_i32_1 = arith.constant 0 : i32
    return %2, %c0_i32_0 : i32, i32
  }
  func.func @transform_3(%arg0: i32, %arg1: i32) -> (i32, i32) {
    %c0_i32 = arith.constant 0 : i32
    %c0_i32_0 = arith.constant 0 : i32
    return %arg0, %c0_i32 : i32, i32
  }
}

</mosaic_0001>

<bundles_post_ra>
// kernel: tpu_custom_call.1
= control target key start
LH: loop header
LB: loop body
LE: loop exit
PB: predicated region body
PF: predicated region fallthrough
CT: control target
= control target key end

     0   :  { %8 = vsyncpa [#allocation4], 0  ;;  %s317_s0 = inlined_call_operand.vmem [shape: f32[16,32], index: 0, kind: input, shape index: {}]   ;;  %s318_s1 = inlined_call_operand.hbm [shape: f32[16,32], index: 1, kind: input, shape index: {}]   ;;  %s319_s2 = inlined_call_operand.vmem [shape: f32[16,1], index: 2, kind: input, shape index: {}]   ;;  %s320_s3 = inlined_call_operand.hbm [shape: f32[8,128], index: 3, kind: output, shape index: {}]  }
   0x1   :  { %9 = vsyncpa [#allocation5], 0  ;;  %s268_s12 = smov [#allocation3]  }
   0x2   :  { %s35_s13 = sshll.u32 %s268_s12, 4  ;;  %s36_s13 = int_to_ptr.vmem [resolvable:$true] %s35_s13 }
   0x3   :  { %s232_s14 = scalar_lea.vmem %s36_s13, 256  ;;  %p237_p1 = scmp.lt.s32.totalorder %s36_s13, %s36_s13 }
   0x4   :  { %p233_p0 = scmp.ne.s32.totalorder %s36_s13, %s232_s14  ;;  %p238_p2 = scmp.lt.s32.totalorder %s232_s14, %s232_s14 }
   0x6   :  { %p239_p3 = por %p238_p2, %p237_p1 }
   0x8   :  { %p240_p4 = pnand %p239_p3, %p233_p0 }
   0xa   :  { %243 = shalt.err (!%p240_p4)
}
   0xb   :  { %s269_s15 = smov 128   ;;  %s270_s16 = smov 8  }
   0xc   :  { %41 = dma.hbm_to_vmem [thread:$0]  %s318_s1, 256, %s36_s13, [#allocation4], %s269_s15, %s269_s15, %s270_s16  }
   0xd   :  { %264 = dma.done.wait [#allocation4], 256  }
   0xe   :  { %265 = vsyncadd [#allocation4], 4294967040  ;;  %v110_v0 = vld [vmem:[%s317_s0] sm:$0xff]  ;;  %v112_v1 = vld [vmem:[#allocation3] sm:$0xff]  ;;  %vm122_vm0 = vcmask 261120   ;;  %vm107_vm1 = vcmask 7168  }
   0xf   :  { %v111_v2 = vld [vmem:[%s317_s0 + $0x8] sm:$0xff]  ;;  %v116_v3 = vsub.f32 %v110_v0, %v112_v1  ;;  %v113_v4 = vld [vmem:[#allocation3 + $0x8] sm:$0xff]  ;;  %v271_v12 = vmov 0.0   ;;  %v114_v20 = vld [vmem:[%s319_s2] sm:$0xff] }
  0x10   :  { %v117_v5 = vsub.f32 %v111_v2, %v113_v4  ;;  %108 = vst.msk [vmem:[#allocation2] sm:$0xff] %vm107_vm1, %v271_v12  ;;  %109 = vst.msk [vmem:[#allocation2 + $0x8] sm:$0xff] %vm107_vm1, %v271_v12  ;;  %v143_v25 = vsub.f32 1.0, %v114_v20  ;;  %v115_v28 = vld [vmem:[%s319_s2 + $0x8] sm:$0xff]  ;;  %s272_s2 = smov [#allocation6]  }
  0x11   :  { %v118_v6 = vadd.f32 1e-06, %v116_v3  ;;  %v144_v34 = vsub.f32 1.0, %v115_v28  ;;  %s190_s25 = sshll.u32 %s272_s2, 4  ;;  %s191_s25 = int_to_ptr.vmem [resolvable:$true] %s190_s25 }
  0x12   :  { %v119_v7 = vadd.f32 1e-06, %v117_v5  ;;  %s244_s27 = scalar_lea.vmem %s191_s25, 128  ;;  %p249_p6 = scmp.lt.s32.totalorder %s191_s25, %s191_s25 }
  0x13   :  { %v120_v8 = vmul.f32 %v118_v6, %v118_v6  ;;  %p245_p5 = scmp.ne.s32.totalorder %s191_s25, %s244_s27  ;;  %p250_p7 = scmp.lt.s32.totalorder %s244_s27, %s244_s27 }
  0x14   :  { %v121_v9 = vmul.f32 %v119_v7, %v119_v7 }
  0x15   :  { %v123_v10 = vsel %vm122_vm0, %v120_v8, 0.0  ;;  %p251_p8 = por %p250_p7, %p249_p6 }
  0x16   :  { %124 = vadd.xlane.f32.xlu0 %v123_v10  ;;  %v126_v11 = vsel %vm122_vm0, %v121_v9, 0.0 }
  0x17   :  { %v157_v36 = vld [vmem:[#allocation2] sm:$0xff]  ;;  %v158_v42 = vld [vmem:[#allocation2 + $0x8] sm:$0xff]  ;;  %p252_p9 = pnand %p251_p8, %p245_p5 }
  0x1a   :  { %127 = vadd.xlane.f32.xlu0 %v126_v11 }
  0x9f   :  { %v125_v13 = vpop.xlane.xlu0 %124 }
  0xa0   :  { %220 = vrsqrt.f32 %v125_v13  ;;  %vm131_vm2 = vcmp.eq.f32.partialorder %v125_v13, inf  ;;  %v134_v17 = vand.u32 2147483648, %v125_v13  ;;  %vm133_vm3 = vcmp.eq.f32.partialorder %v125_v13, 0.0 }
  0xa1   :  { %v145_v32 = vmul.f32 %v143_v25, %v125_v13 }
  0xa3   :  { %v128_v14 = vpop.xlane.xlu0 %127 }
  0xa4   :  { %222 = vrsqrt.f32 %v128_v14  ;;  %vm138_vm4 = vcmp.eq.f32.partialorder %v128_v14, inf  ;;  %v141_v24 = vand.u32 2147483648, %v128_v14  ;;  %vm140_vm5 = vcmp.eq.f32.partialorder %v128_v14, 0.0 }
  0xa5   :  { %v146_v39 = vmul.f32 %v144_v34, %v128_v14 }
  0xad   :  { %v221_v15 = vpop.eup %220 }
  0xae   :  { %v130_v16 = vmul.f32 %v221_v15, %v125_v13 }
  0xb0   :  { %v132_v18 = vsel %vm131_vm2, %v125_v13, %v130_v16 }
  0xb1   :  { %v223_v19 = vpop.eup %222  ;;  %v135_v21 = vsel %vm133_vm3, %v134_v17, %v132_v18 }
  0xb2   :  { %v147_v22 = vsub.f32 0.5, %v135_v21  ;;  %v137_v23 = vmul.f32 %v223_v19, %v128_v14 }
  0xb4   :  { %v149_v26 = vmax.f32 %v147_v22, 0.0  ;;  %v139_v27 = vsel %vm138_vm4, %v128_v14, %v137_v23 }
  0xb5   :  { %v142_v29 = vsel %vm140_vm5, %v141_v24, %v139_v27 }
  0xb6   :  { %v151_v30 = vmul.f32 %v149_v26, %v149_v26  ;;  %v148_v31 = vsub.f32 0.5, %v142_v29 }
  0xb8   :  { %v153_v33 = vmul.f32 %v151_v30, %v114_v20  ;;  %v150_v35 = vmax.f32 %v148_v31, 0.0 }
  0xba   :  { %v155_v37 = vadd.f32 %v153_v33, %v145_v32  ;;  %v152_v38 = vmul.f32 %v150_v35, %v150_v35 }
  0xbc   :  { %v154_v40 = vmul.f32 %v152_v38, %v115_v28  ;;  %v159_v41 = vadd.f32 %v157_v36, %v155_v37 }
  0xbe   :  { %v156_v43 = vadd.f32 %v154_v40, %v146_v39  ;;  %162 = vst.msk [vmem:[#allocation2] sm:$0xff] %vm107_vm1, %v159_v41 }
  0xc0   :  { %v160_v44 = vadd.f32 %v158_v42, %v156_v43 }
  0xc2   :  { %163 = vst.msk [vmem:[#allocation2 + $0x8] sm:$0xff] %vm107_vm1, %v160_v44 }
  0xc5   :  { %v167_v45 = vld [vmem:[#allocation2] sm:$0xff] }
  0xc6   :  { %v169_v47 = vsel %vm107_vm1, %v167_v45, 0.0 }
  0xc9   :  { %v168_v46 = vld [vmem:[#allocation2 + $0x8] sm:$0xff] }
  0xca   :  { %v170_v48 = vsel %vm107_vm1, %v168_v46, 0.0 }
  0xcb   :  { %v171_v49 = vadd.f32 %v170_v48, %v169_v47 }
  0xcd   :  { %172 = vadd.xlane.f32.xlu1 %v171_v49 }
 0x156   :  { %v173_v50 = vpop.xlane.xlu1 %172 }
 0x157   :  { %v174_v51 = vrot.slane %v173_v50, 4 }
 0x159   :  { %v175_v52 = vadd.f32 %v174_v51, %v173_v50 }
 0x15b   :  { %v176_v53 = vrot.slane %v175_v52, 2 }
 0x15d   :  { %v177_v54 = vadd.f32 %v176_v53, %v175_v52 }
 0x15f   :  { %v178_v55 = vrot.slane %v177_v54, 1 }
 0x161   :  { %v179_v56 = vadd.f32 %v178_v55, %v177_v54 }
 0x163   :  { %213 = vpush %v179_v56 }
 0x194   :  { %s214_s26 = spop %213 }
 0x195   :  { %v181_v57 = vstv %s214_s26 }
 0x196   :  { %183 = vst [vmem:[#allocation6] sm:$0xff] %v181_v57 }
 0x197   :  { %255 = shalt.err (!%p252_p9)
}
 0x198   :  { %193 = dma.vmem_to_hbm [thread:$0]  %s191_s25, 128, %s320_s3, [#allocation5]  }
 0x199   :  { %266 = dma.done.wait [#allocation5], 128  }
 0x19a   :  { %267 = vsyncadd [#allocation5], 4294967168 }
 0x19b   :  { %197 = vsyncpa [#allocation4], 1 }
 0x19c   :  { %198 = vsyncpa [#allocation5], 1 }

</bundles_post_ra>
